<compile_context>
chip_gen: v7x
topology: tpu7x:2x2x1
jax: 0.10.0
libtpu: 0.0.40
codegen_flags: <defaults>
</compile_context>

<pallas_src>
import functools

import jax
import jax.numpy as jnp
from jax.experimental import pallas as pl
from jax.experimental.pallas import tpu as pltpu

EMBEDDING_SIZE = 64
NUM_FEATURES = 9


# --------------------------------------------------------------------------
# Fused Pallas kernel: 4x (GCNConv + tanh) -> max/mean pool -> Linear
# --------------------------------------------------------------------------
def gcn_fused_kernel(a_ref, x_ref,
                     w0_ref, b0_ref, w1_ref, b1_ref,
                     w2_ref, b2_ref, w3_ref, b3_ref,
                     mask_bn_ref, w_out_t_ref, b_out_ref,
                     pooled_ref, out_ref):
    a = a_ref[...]                                             # (N, N)

    def gcn_layer(h, w_ref, b_ref):
        # PyG GCNConv: transform then aggregate:  tanh(A_hat @ (h @ W) + b)
        hw = jnp.dot(h, w_ref[...], preferred_element_type=jnp.float32)
        return jnp.tanh(
            jnp.dot(a, hw, preferred_element_type=jnp.float32) + b_ref[...])

    h = gcn_layer(x_ref[...], w0_ref, b0_ref)                  # (N, E)
    h = gcn_layer(h, w1_ref, b1_ref)
    h = gcn_layer(h, w2_ref, b2_ref)
    h = gcn_layer(h, w3_ref, b3_ref)

    m_bn = mask_bn_ref[...]                                    # (B, N)

    # global mean pool:  (M @ H) * 1/counts   (reciprocal on the EUP slot)
    counts = jnp.sum(m_bn, axis=1, keepdims=True)              # (B, 1)
    inv_counts = pl.reciprocal(jnp.maximum(counts, 1.0), approx=True)
    mean = jnp.dot(m_bn, h, preferred_element_type=jnp.float32) * inv_counts

    # global max pool: one vectorized select over (B, N, E), reduce node axis
    masked = jnp.where(m_bn[:, :, None] > 0.0, h[None, :, :],
                       jnp.float32(-1e30))                     # (B, N, E)
    mx = jnp.max(masked, axis=1)                               # (B, E)

    pooled = jnp.concatenate([mx, mean], axis=1)               # (B, 2E)
    pooled_ref[...] = pooled

    # final Linear (2E -> 1) as a VPU multiply + lane reduce (avoids an MXU
    # drain for a single useful output lane).
    out_ref[...] = (jnp.sum(pooled * w_out_t_ref[...], axis=1, keepdims=True)
                    + b_out_ref[...])


def gcn_forward(params, x, a_hat, mask_bn):
    n = x.shape[0]
    b = mask_bn.shape[0]
    e = EMBEDDING_SIZE
    f = x.shape[1]

    w_out_t = params["w_out"].T                                # (1, 2E)
    inputs = (a_hat, x,
              params["w0"], params["b0"], params["w1"], params["b1"],
              params["w2"], params["b2"], params["w3"], params["b3"],
              mask_bn, w_out_t, params["b_out"])

    # Advisory cost estimate so XLA can overlap this tiny, latency-bound call.
    flops = 2 * n * e * (f + n)                # layer 0
    flops += 3 * 2 * n * e * (e + n)           # layers 1..3
    flops += 2 * b * n * e                     # mean-pool matmul
    flops += b * n * e                         # max-pool select/compare
    flops += 2 * b * 2 * e                     # final projection
    bytes_accessed = 4 * (sum(int(jnp.size(t)) for t in inputs)
                          + b * 2 * e + b * 1)
    cost = pl.CostEstimate(flops=int(flops),
                           transcendentals=int(4 * n * e),
                           bytes_accessed=int(bytes_accessed))

    pooled, out = pl.pallas_call(
        gcn_fused_kernel,
        out_shape=(
            jax.ShapeDtypeStruct((b, 2 * e), jnp.float32),
            jax.ShapeDtypeStruct((b, 1), jnp.float32),
        ),
        in_specs=[pl.BlockSpec(memory_space=pltpu.MemorySpace.VMEM)]
        * len(inputs),
        out_specs=(
            pl.BlockSpec(memory_space=pltpu.MemorySpace.VMEM),
            pl.BlockSpec(memory_space=pltpu.MemorySpace.VMEM),
        ),
        cost_estimate=cost,
    )(*inputs)
    return out, pooled


# --------------------------------------------------------------------------
# Glue: dense normalized adjacency, batch masks, parameter init, reference
# --------------------------------------------------------------------------
def normalized_adjacency(edge_index, num_nodes):
    """D^-1/2 (A + I) D^-1/2 for an undirected edge list (2, E)."""
    src, dst = edge_index[0], edge_index[1]
    a = jnp.zeros((num_nodes, num_nodes), jnp.float32)
    a = a.at[dst, src].set(1.0)
    a = a.at[src, dst].set(1.0)                       # symmetrize
    a = a + jnp.eye(num_nodes, dtype=jnp.float32)     # self loops
    deg = jnp.sum(a, axis=1)
    d_inv_sqrt = 1.0 / jnp.sqrt(deg)
    return d_inv_sqrt[:, None] * a * d_inv_sqrt[None, :]


def batch_masks(batch_index, num_graphs):
    return (batch_index[None, :]
            == jnp.arange(num_graphs)[:, None]).astype(jnp.float32)


def glorot(key, shape):
    fan_in, fan_out = shape
    limit = jnp.sqrt(6.0 / (fan_in + fan_out))
    return jax.random.uniform(key, shape, jnp.float32, -limit, limit)


def init_params(key):
    ks = jax.random.split(key, 6)
    return {
        "w0": glorot(ks[0], (NUM_FEATURES, EMBEDDING_SIZE)),
        "b0": jnp.zeros((1, EMBEDDING_SIZE), jnp.float32),
        "w1": glorot(ks[1], (EMBEDDING_SIZE, EMBEDDING_SIZE)),
        "b1": jnp.zeros((1, EMBEDDING_SIZE), jnp.float32),
        "w2": glorot(ks[2], (EMBEDDING_SIZE, EMBEDDING_SIZE)),
        "b2": jnp.zeros((1, EMBEDDING_SIZE), jnp.float32),
        "w3": glorot(ks[3], (EMBEDDING_SIZE, EMBEDDING_SIZE)),
        "b3": jnp.zeros((1, EMBEDDING_SIZE), jnp.float32),
        "w_out": glorot(ks[4], (2 * EMBEDDING_SIZE, 1)),
        "b_out": jax.random.uniform(ks[5], (1, 1), jnp.float32, -0.05, 0.05),
    }


def gcn_forward_ref(params, x, a_hat, mask_bn):
    """Plain-JAX reference for correctness checking."""
    h = x
    for wk, bk in (("w0", "b0"), ("w1", "b1"), ("w2", "b2"), ("w3", "b3")):
        h = jnp.tanh(a_hat @ (h @ params[wk]) + params[bk])
    counts = jnp.maximum(jnp.sum(mask_bn, axis=1, keepdims=True), 1.0)
    mean = (mask_bn @ h) / counts
    masked = jnp.where(mask_bn[:, :, None] > 0, h[None, :, :], -1e30)
    mx = jnp.max(masked, axis=1)
    pooled = jnp.concatenate([mx, mean], axis=1)
    out = pooled @ params["w_out"] + params["b_out"]
    return out, pooled


# --------------------------------------------------------------------------
if __name__ == "__main__":
    key = jax.random.PRNGKey(0)
    k_feat, k_param = jax.random.split(key)

    # Two small molecular graphs of 8 nodes each (N = 16 total nodes).
    N = 16
    B = 2
    edges = []
    for base in (0, 8):
        for i in range(8):
            edges.append((base + i, base + (i + 1) % 8))   # ring
        edges.append((base + 0, base + 4))                 # chord
    edge_index = jnp.array(edges, dtype=jnp.int32).T       # (2, 18)
    batch_index = jnp.array([0] * 8 + [1] * 8, dtype=jnp.int32)

    x = jax.random.normal(k_feat, (N, NUM_FEATURES), jnp.float32)
    params = init_params(k_param)

    a_hat = normalized_adjacency(edge_index, N)
    mask_bn = batch_masks(batch_index, B)

    out, pooled = gcn_forward(params, x, a_hat, mask_bn)
    out = jax.block_until_ready(out)
    pooled = jax.block_until_ready(pooled)

    # Sanity check against plain-JAX reference.  Tolerance is loosened a bit
    # because the mean-pool uses the hardware approximate reciprocal (EUP).
    out_ref, pooled_ref = gcn_forward_ref(params, x, a_hat, mask_bn)
    assert out.shape == (B, 1) and pooled.shape == (B, 2 * EMBEDDING_SIZE)
    assert jnp.allclose(pooled, pooled_ref, atol=5e-3, rtol=5e-3)
    assert jnp.allclose(out, out_ref, atol=5e-3, rtol=5e-3)

    print("KERNEL_OK")
</pallas_src>

<mosaic_0001>
module attributes {stable_mosaic.version = 11 : i64} {
  func.func @gcn_fused_kernel(%arg0: memref<16x16xf32, #tpu.memory_space<vmem>>, %arg1: memref<16x9xf32, #tpu.memory_space<vmem>>, %arg2: memref<9x64xf32, #tpu.memory_space<vmem>>, %arg3: memref<1x64xf32, #tpu.memory_space<vmem>>, %arg4: memref<64x64xf32, #tpu.memory_space<vmem>>, %arg5: memref<1x64xf32, #tpu.memory_space<vmem>>, %arg6: memref<64x64xf32, #tpu.memory_space<vmem>>, %arg7: memref<1x64xf32, #tpu.memory_space<vmem>>, %arg8: memref<64x64xf32, #tpu.memory_space<vmem>>, %arg9: memref<1x64xf32, #tpu.memory_space<vmem>>, %arg10: memref<2x16xf32, #tpu.memory_space<vmem>>, %arg11: memref<1x128xf32, #tpu.memory_space<vmem>>, %arg12: memref<1x1xf32, #tpu.memory_space<vmem>>, %arg13: memref<2x128xf32, #tpu.memory_space<vmem>>, %arg14: memref<2x1xf32, #tpu.memory_space<vmem>>) attributes {dimension_semantics = [], scalar_prefetch = 0 : i64, scratch_operands = 0 : i64, tpu.core_type = #tpu.core_type<tc>} {
    %c0 = arith.constant 0 : index
    %c0_0 = arith.constant 0 : index
    %0 = vector.load %arg0[%c0, %c0_0] : memref<16x16xf32, #tpu.memory_space<vmem>>, vector<16x16xf32>
    %c0_1 = arith.constant 0 : index
    %c0_2 = arith.constant 0 : index
    %1 = vector.load %arg1[%c0_1, %c0_2] : memref<16x9xf32, #tpu.memory_space<vmem>>, vector<16x9xf32>
    %c0_3 = arith.constant 0 : index
    %c0_4 = arith.constant 0 : index
    %2 = vector.load %arg2[%c0_3, %c0_4] : memref<9x64xf32, #tpu.memory_space<vmem>>, vector<9x64xf32>
    %cst = arith.constant dense<0.000000e+00> : vector<16x64xf32>
    %3 = tpu.matmul %1, %2, %cst {dimension_numbers = #tpu.dot_dimension_numbers<[1], [0], [0], [1], [0, 0, 1, 1], [], []>} : vector<16x9xf32>, vector<9x64xf32>, vector<16x64xf32> -> vector<16x64xf32>
    %cst_5 = arith.constant dense<0.000000e+00> : vector<16x64xf32>
    %4 = tpu.matmul %0, %3, %cst_5 {dimension_numbers = #tpu.dot_dimension_numbers<[1], [0], [0], [1], [0, 0, 1, 1], [], []>} : vector<16x16xf32>, vector<16x64xf32>, vector<16x64xf32> -> vector<16x64xf32>
    %c0_6 = arith.constant 0 : index
    %c0_7 = arith.constant 0 : index
    %5 = vector.load %arg3[%c0_6, %c0_7] : memref<1x64xf32, #tpu.memory_space<vmem>>, vector<1x64xf32>
    %6 = vector.broadcast %5 : vector<1x64xf32> to vector<16x64xf32>
    %7 = arith.addf %4, %6 : vector<16x64xf32>
    %8 = math.tanh %7 : vector<16x64xf32>
    %c0_8 = arith.constant 0 : index
    %c0_9 = arith.constant 0 : index
    %9 = vector.load %arg4[%c0_8, %c0_9] : memref<64x64xf32, #tpu.memory_space<vmem>>, vector<64x64xf32>
    %cst_10 = arith.constant dense<0.000000e+00> : vector<16x64xf32>
    %10 = tpu.matmul %8, %9, %cst_10 {dimension_numbers = #tpu.dot_dimension_numbers<[1], [0], [0], [1], [0, 0, 1, 1], [], []>} : vector<16x64xf32>, vector<64x64xf32>, vector<16x64xf32> -> vector<16x64xf32>
    %cst_11 = arith.constant dense<0.000000e+00> : vector<16x64xf32>
    %11 = tpu.matmul %0, %10, %cst_11 {dimension_numbers = #tpu.dot_dimension_numbers<[1], [0], [0], [1], [0, 0, 1, 1], [], []>} : vector<16x16xf32>, vector<16x64xf32>, vector<16x64xf32> -> vector<16x64xf32>
    %c0_12 = arith.constant 0 : index
    %c0_13 = arith.constant 0 : index
    %12 = vector.load %arg5[%c0_12, %c0_13] : memref<1x64xf32, #tpu.memory_space<vmem>>, vector<1x64xf32>
    %13 = vector.broadcast %12 : vector<1x64xf32> to vector<16x64xf32>
    %14 = arith.addf %11, %13 : vector<16x64xf32>
    %15 = math.tanh %14 : vector<16x64xf32>
    %c0_14 = arith.constant 0 : index
    %c0_15 = arith.constant 0 : index
    %16 = vector.load %arg6[%c0_14, %c0_15] : memref<64x64xf32, #tpu.memory_space<vmem>>, vector<64x64xf32>
    %cst_16 = arith.constant dense<0.000000e+00> : vector<16x64xf32>
    %17 = tpu.matmul %15, %16, %cst_16 {dimension_numbers = #tpu.dot_dimension_numbers<[1], [0], [0], [1], [0, 0, 1, 1], [], []>} : vector<16x64xf32>, vector<64x64xf32>, vector<16x64xf32> -> vector<16x64xf32>
    %cst_17 = arith.constant dense<0.000000e+00> : vector<16x64xf32>
    %18 = tpu.matmul %0, %17, %cst_17 {dimension_numbers = #tpu.dot_dimension_numbers<[1], [0], [0], [1], [0, 0, 1, 1], [], []>} : vector<16x16xf32>, vector<16x64xf32>, vector<16x64xf32> -> vector<16x64xf32>
    %c0_18 = arith.constant 0 : index
    %c0_19 = arith.constant 0 : index
    %19 = vector.load %arg7[%c0_18, %c0_19] : memref<1x64xf32, #tpu.memory_space<vmem>>, vector<1x64xf32>
    %20 = vector.broadcast %19 : vector<1x64xf32> to vector<16x64xf32>
    %21 = arith.addf %18, %20 : vector<16x64xf32>
    %22 = math.tanh %21 : vector<16x64xf32>
    %c0_20 = arith.constant 0 : index
    %c0_21 = arith.constant 0 : index
    %23 = vector.load %arg8[%c0_20, %c0_21] : memref<64x64xf32, #tpu.memory_space<vmem>>, vector<64x64xf32>
    %cst_22 = arith.constant dense<0.000000e+00> : vector<16x64xf32>
    %24 = tpu.matmul %22, %23, %cst_22 {dimension_numbers = #tpu.dot_dimension_numbers<[1], [0], [0], [1], [0, 0, 1, 1], [], []>} : vector<16x64xf32>, vector<64x64xf32>, vector<16x64xf32> -> vector<16x64xf32>
    %cst_23 = arith.constant dense<0.000000e+00> : vector<16x64xf32>
    %25 = tpu.matmul %0, %24, %cst_23 {dimension_numbers = #tpu.dot_dimension_numbers<[1], [0], [0], [1], [0, 0, 1, 1], [], []>} : vector<16x16xf32>, vector<16x64xf32>, vector<16x64xf32> -> vector<16x64xf32>
    %c0_24 = arith.constant 0 : index
    %c0_25 = arith.constant 0 : index
    %26 = vector.load %arg9[%c0_24, %c0_25] : memref<1x64xf32, #tpu.memory_space<vmem>>, vector<1x64xf32>
    %27 = vector.broadcast %26 : vector<1x64xf32> to vector<16x64xf32>
    %28 = arith.addf %25, %27 : vector<16x64xf32>
    %29 = math.tanh %28 : vector<16x64xf32>
    %c0_26 = arith.constant 0 : index
    %c0_27 = arith.constant 0 : index
    %30 = vector.load %arg10[%c0_26, %c0_27] : memref<2x16xf32, #tpu.memory_space<vmem>>, vector<2x16xf32>
    %cst_28 = arith.constant dense<0.000000e+00> : vector<2xf32>
    %31 = vector.multi_reduction <add>, %30, %cst_28 [1] : vector<2x16xf32> to vector<2xf32>
    %32 = vector.shape_cast %31 : vector<2xf32> to vector<2x1xf32>
    %cst_29 = arith.constant 1.000000e+00 : f32
    %33 = vector.broadcast %cst_29 : f32 to vector<2x1xf32>
    %34 = arith.maximumf %32, %33 : vector<2x1xf32>
    %35 = tpu.reciprocal %34 {approx = true} : vector<2x1xf32> -> vector<2x1xf32>
    %cst_30 = arith.constant dense<0.000000e+00> : vector<2x64xf32>
    %36 = tpu.matmul %30, %29, %cst_30 {dimension_numbers = #tpu.dot_dimension_numbers<[1], [0], [0], [1], [0, 0, 1, 1], [], []>} : vector<2x16xf32>, vector<16x64xf32>, vector<2x64xf32> -> vector<2x64xf32>
    %37 = vector.broadcast %35 : vector<2x1xf32> to vector<2x64xf32>
    %38 = arith.mulf %36, %37 : vector<2x64xf32>
    %39 = vector.shape_cast %30 : vector<2x16xf32> to vector<2x16x1xf32>
    %cst_31 = arith.constant 0.000000e+00 : f32
    %40 = vector.broadcast %cst_31 : f32 to vector<2x16x1xf32>
    %41 = arith.cmpf ogt, %39, %40 : vector<2x16x1xf32>
    %42 = vector.shape_cast %29 : vector<16x64xf32> to vector<1x16x64xf32>
    %cst_32 = arith.constant -1.000000e+30 : f32
    %43 = vector.shape_cast %41 : vector<2x16x1xi1> to vector<2x16x1xi1>
    %44 = vector.broadcast %43 : vector<2x16x1xi1> to vector<2x16x64xi1>
    %45 = vector.shape_cast %42 : vector<1x16x64xf32> to vector<1x16x64xf32>
    %46 = vector.broadcast %45 : vector<1x16x64xf32> to vector<2x16x64xf32>
    %47 = vector.broadcast %cst_32 : f32 to vector<2x16x64xf32>
    %48 = arith.select %44, %46, %47 : vector<2x16x64xi1>, vector<2x16x64xf32>
    %cst_33 = arith.constant dense<0xFF800000> : vector<2x64xf32>
    %49 = vector.multi_reduction <maximumf>, %48, %cst_33 [1] : vector<2x16x64xf32> to vector<2x64xf32>
    %50 = tpu.concatenate %49, %38 in 1 : vector<2x64xf32>, vector<2x64xf32> -> vector<2x128xf32>
    %c0_34 = arith.constant 0 : index
    %c0_35 = arith.constant 0 : index
    %51 = vector.load %arg13[%c0_34, %c0_35] : memref<2x128xf32, #tpu.memory_space<vmem>>, vector<2x128xf32>
    tpu.vector_store %arg13[%c0_34, %c0_35], %50 {strides = array<i32>} : memref<2x128xf32, #tpu.memory_space<vmem>>, vector<2x128xf32>,
    %c0_36 = arith.constant 0 : index
    %c0_37 = arith.constant 0 : index
    %52 = vector.load %arg11[%c0_36, %c0_37] : memref<1x128xf32, #tpu.memory_space<vmem>>, vector<1x128xf32>
    %53 = vector.broadcast %52 : vector<1x128xf32> to vector<2x128xf32>
    %54 = arith.mulf %50, %53 : vector<2x128xf32>
    %cst_38 = arith.constant dense<0.000000e+00> : vector<2xf32>
    %55 = vector.multi_reduction <add>, %54, %cst_38 [1] : vector<2x128xf32> to vector<2xf32>
    %56 = vector.shape_cast %55 : vector<2xf32> to vector<2x1xf32>
    %c0_39 = arith.constant 0 : index
    %c0_40 = arith.constant 0 : index
    %57 = vector.load %arg12[%c0_39, %c0_40] : memref<1x1xf32, #tpu.memory_space<vmem>>, vector<1x1xf32>
    %58 = vector.broadcast %57 : vector<1x1xf32> to vector<2x1xf32>
    %59 = arith.addf %56, %58 : vector<2x1xf32>
    %c0_41 = arith.constant 0 : index
    %c0_42 = arith.constant 0 : index
    %60 = vector.load %arg14[%c0_41, %c0_42] : memref<2x1xf32, #tpu.memory_space<vmem>>, vector<2x1xf32>
    tpu.vector_store %arg14[%c0_41, %c0_42], %59 {strides = array<i32>} : memref<2x1xf32, #tpu.memory_space<vmem>>, vector<2x1xf32>,
    return
  }
}

</mosaic_0001>

<bundles_post_ra>
// kernel: tpu_custom_call.1
= control target key start
LH: loop header
LB: loop body
LE: loop exit
PB: predicated region body
PF: predicated region fallthrough
CT: control target
= control target key end

     0   :  { %s1739_s0 = inlined_call_operand.hbm [shape: f32[16,16], index: 0, kind: input, shape index: {}]   ;;  %s1740_s1 = inlined_call_operand.hbm [shape: f32[16,9], index: 1, kind: input, shape index: {}]   ;;  %s1741_s2 = inlined_call_operand.hbm [shape: f32[9,64], index: 2, kind: input, shape index: {}]   ;;  %s1742_s3 = inlined_call_operand.vmem [shape: f32[1,64], index: 3, kind: input, shape index: {}]   ;;  %s1743_s4 = inlined_call_operand.hbm [shape: f32[64,64], index: 4, kind: input, shape index: {}]   ;;  %s1744_s5 = inlined_call_operand.vmem [shape: f32[1,64], index: 5, kind: input, shape index: {}]   ;;  %s1745_s6 = inlined_call_operand.hbm [shape: f32[64,64], index: 6, kind: input, shape index: {}]   ;;  %s1746_s7 = inlined_call_operand.vmem [shape: f32[1,64], index: 7, kind: input, shape index: {}]   ;;  %s1747_s8 = inlined_call_operand.hbm [shape: f32[64,64], index: 8, kind: input, shape index: {}]   ;;  %s1748_s9 = inlined_call_operand.vmem [shape: f32[1,64], index: 9, kind: input, shape index: {}]   ;;  %s1749_s10 = inlined_call_operand.vmem [shape: f32[2,16], index: 10, kind: input, shape index: {}]   ;;  %s1750_s11 = inlined_call_operand.vmem [shape: f32[1,128], index: 11, kind: input, shape index: {}]   ;;  %s1751_s12 = inlined_call_operand.<no memory space> [shape: f32[1,1], index: 12, kind: input, shape index: {}]   ;;  %s1752_s13 = inlined_call_operand.hbm [shape: f32[2,128], index: 13, kind: output, shape index: {0}]   ;;  %s1753_s14 = inlined_call_operand.vmem [shape: f32[2,1], index: 14, kind: output, shape index: {1}]  }
   0x1   :  { %v20_v0 = vstv %s1751_s12 }
   0x2   :  { %21 = vst [vmem:[#allocation2] sm:$0x1] %v20_v0 }
   0x3   :  { %22 = vsyncpa [#allocation4], 0 }
   0x4   :  { %23 = vsyncpa [#allocation7], 0 }
   0x5   :  { %24 = vsyncpa [#allocation10], 0 }
   0x6   :  { %25 = vsyncpa [#allocation13], 0 }
   0x7   :  { %26 = vsyncpa [#allocation5], 0  ;;  %s1471_s15 = smov [#allocation6]   ;;  %s1472_s17 = smov [#allocation9]  }
   0x8   :  { %s44_s16 = sshll.u32 %s1471_s15, 4  ;;  %s70_s18 = sshll.u32 %s1472_s17, 4  ;;  %s45_s16 = int_to_ptr.vmem [resolvable:$true] %s44_s16  ;;  %s1563_s18 = int_to_ptr.vmem [resolvable:$true] %s70_s18 }
   0x9   :  { %s1307_s21 = scalar_lea.hbm %s1740_s1, 256 }
   0xa   :  { %p1308_p0 = scmp.ne.s32.totalorder %s1740_s1, %s1307_s21  ;;  %p1311_p1 = scmp.lt.u32.totalorder %s1307_s21, %s1740_s1 }
   0xc   :  { %p1313_p2 = pnand %p1311_p1, %p1308_p0 }
   0xe   :  { %1316 = shalt.err (!%p1313_p2)
}
   0xf   :  { %s1317_s25 = scalar_lea.vmem %s45_s16, 256  ;;  %p1322_p4 = scmp.lt.s32.totalorder %s45_s16, %s45_s16 }
  0x10   :  { %p1318_p3 = scmp.ne.s32.totalorder %s45_s16, %s1317_s25  ;;  %p1323_p5 = scmp.lt.s32.totalorder %s1317_s25, %s1317_s25 }
  0x12   :  { %p1324_p6 = por %p1323_p5, %p1322_p4 }
  0x14   :  { %p1325_p7 = pnand %p1324_p6, %p1318_p3 }
  0x16   :  { %1328 = shalt.err (!%p1325_p7)
}
  0x17   :  { %s1473_s26 = smov 128   ;;  %s1474_s27 = smov 8  }
  0x18   :  { %50 = dma.hbm_to_vmem [thread:$0]  %s1740_s1, 256, %s45_s16, [#allocation7], %s1473_s26, %s1473_s26, %s1474_s27  }
  0x19   :  { %s1329_s17 = scalar_lea.hbm %s1743_s4, 1024 }
  0x1a   :  { %p1330_p8 = scmp.ne.s32.totalorder %s1743_s4, %s1329_s17  ;;  %p1333_p9 = scmp.lt.u32.totalorder %s1329_s17, %s1743_s4 }
  0x1c   :  { %p1335_p10 = pnand %p1333_p9, %p1330_p8 }
  0x1e   :  { %1338 = shalt.err (!%p1335_p10)
}
  0x1f   :  { %s1339_s23 = scalar_lea.vmem %s1563_s18, 1024  ;;  %p1344_p12 = scmp.lt.s32.totalorder %s1563_s18, %s1563_s18 }
  0x20   :  { %p1340_p11 = scmp.ne.s32.totalorder %s1563_s18, %s1339_s23  ;;  %p1345_p13 = scmp.lt.s32.totalorder %s1339_s23, %s1339_s23 }
  0x22   :  { %p1346_p0 = por %p1345_p13, %p1344_p12 }
  0x24   :  { %p1347_p1 = pnand %p1346_p0, %p1340_p11 }
  0x26   :  { %1350 = shalt.err (!%p1347_p1)
}
  0x27   :  { %76 = dma.hbm_to_vmem [thread:$0]  %s1743_s4, 1024, %s1563_s18, [#allocation10], %s1473_s26, %s1473_s26, %s1474_s27  }
  0x28   :  { %s1475_s12 = smov [#allocation3]   ;;  %s1476_s25 = smov [#allocation8]  }
  0x29   :  { %s32_s24 = sshll.u32 %s1475_s12, 4  ;;  %s56_s28 = sshll.u32 %s1476_s25, 4  ;;  %s33_s24 = int_to_ptr.vmem [resolvable:$true] %s32_s24  ;;  %s1600_s28 = int_to_ptr.vmem [resolvable:$true] %s56_s28 }
  0x2a   :  { %s1351_s15 = scalar_lea.hbm %s1739_s0, 256 }
  0x2b   :  { %p1352_p2 = scmp.ne.s32.totalorder %s1739_s0, %s1351_s15  ;;  %p1355_p3 = scmp.lt.u32.totalorder %s1351_s15, %s1739_s0 }
  0x2d   :  { %p1357_p4 = pnand %p1355_p3, %p1352_p2 }
  0x2f   :  { %1360 = shalt.err (!%p1357_p4)
}
  0x30   :  { %s1361_s4 = scalar_lea.vmem %s33_s24, 256  ;;  %p1366_p6 = scmp.lt.s32.totalorder %s33_s24, %s33_s24 }
  0x31   :  { %p1362_p5 = scmp.ne.s32.totalorder %s33_s24, %s1361_s4  ;;  %p1367_p7 = scmp.lt.s32.totalorder %s1361_s4, %s1361_s4 }
  0x33   :  { %p1368_p8 = por %p1367_p7, %p1366_p6 }
  0x35   :  { %p1369_p9 = pnand %p1368_p8, %p1362_p5 }
  0x37   :  { %1372 = shalt.err (!%p1369_p9)
}
  0x38   :  { %38 = dma.hbm_to_vmem [thread:$0]  %s1739_s0, 256, %s33_s24, [#allocation4], %s1473_s26, %s1473_s26, %s1474_s27  }
  0x39   :  { %s1373_s16 = scalar_lea.hbm %s1741_s2, 256 }
  0x3a   :  { %p1374_p10 = scmp.ne.s32.totalorder %s1741_s2, %s1373_s16  ;;  %p1377_p11 = scmp.lt.u32.totalorder %s1373_s16, %s1741_s2 }
  0x3c   :  { %p1379_p12 = pnand %p1377_p11, %p1374_p10 }
  0x3e   :  { %1382 = shalt.err (!%p1379_p12)
}
  0x3f   :  { %s1383_s15 = scalar_lea.vmem %s1600_s28, 256  ;;  %p1388_p0 = scmp.lt.s32.totalorder %s1600_s28, %s1600_s28 }
  0x40   :  { %p1384_p13 = scmp.ne.s32.totalorder %s1600_s28, %s1383_s15  ;;  %p1389_p1 = scmp.lt.s32.totalorder %s1383_s15, %s1383_s15 }
  0x42   :  { %p1390_p2 = por %p1389_p1, %p1388_p0 }
  0x44   :  { %p1391_p3 = pnand %p1390_p2, %p1384_p13 }
  0x46   :  { %1394 = shalt.err (!%p1391_p3)
}
  0x47   :  { %62 = dma.hbm_to_vmem [thread:$0]  %s1741_s2, 256, %s1600_s28, [#allocation7], %s1473_s26, %s1473_s26, %s1474_s27  }
  0x48   :  { %s1477_s17 = smov [#allocation11]   ;;  %s1478_s20 = smov [#allocation12]  }
  0x49   :  { %s84_s19 = sshll.u32 %s1477_s17, 4  ;;  %s98_s21 = sshll.u32 %s1478_s20, 4  ;;  %s85_s19 = int_to_ptr.vmem [resolvable:$true] %s84_s19  ;;  %s1637_s21 = int_to_ptr.vmem [resolvable:$true] %s98_s21 }
  0x4a   :  { %s1395_s22 = scalar_lea.hbm %s1745_s6, 1024 }
  0x4b   :  { %p1396_p4 = scmp.ne.s32.totalorder %s1745_s6, %s1395_s22  ;;  %p1399_p5 = scmp.lt.u32.totalorder %s1395_s22, %s1745_s6 }
  0x4d   :  { %p1401_p6 = pnand %p1399_p5, %p1396_p4 }
  0x4f   :  { %1404 = shalt.err (!%p1401_p6)
}
  0x50   :  { %s1405_s2 = scalar_lea.vmem %s85_s19, 1024  ;;  %p1410_p8 = scmp.lt.s32.totalorder %s85_s19, %s85_s19 }
  0x51   :  { %p1406_p7 = scmp.ne.s32.totalorder %s85_s19, %s1405_s2  ;;  %p1411_p9 = scmp.lt.s32.totalorder %s1405_s2, %s1405_s2 }
  0x53   :  { %p1412_p10 = por %p1411_p9, %p1410_p8 }
  0x55   :  { %p1413_p11 = pnand %p1412_p10, %p1406_p7 }
  0x57   :  { %1416 = shalt.err (!%p1413_p11)
}
  0x58   :  { %90 = dma.hbm_to_vmem [thread:$0]  %s1745_s6, 1024, %s85_s19, [#allocation10], %s1473_s26, %s1473_s26, %s1474_s27  }
  0x59   :  { %s1417_s15 = scalar_lea.hbm %s1747_s8, 1024 }
  0x5a   :  { %p1418_p12 = scmp.ne.s32.totalorder %s1747_s8, %s1417_s15  ;;  %p1421_p13 = scmp.lt.u32.totalorder %s1417_s15, %s1747_s8 }
  0x5c   :  { %p1423_p0 = pnand %p1421_p13, %p1418_p12 }
  0x5e   :  { %1426 = shalt.err (!%p1423_p0)
}
  0x5f   :  { %s1427_s4 = scalar_lea.vmem %s1637_s21, 1024  ;;  %p1432_p2 = scmp.lt.s32.totalorder %s1637_s21, %s1637_s21 }
  0x60   :  { %p1428_p1 = scmp.ne.s32.totalorder %s1637_s21, %s1427_s4  ;;  %p1433_p3 = scmp.lt.s32.totalorder %s1427_s4, %s1427_s4 }
  0x62   :  { %p1434_p4 = por %p1433_p3, %p1432_p2 }
  0x64   :  { %p1435_p5 = pnand %p1434_p4, %p1428_p1 }
  0x66   :  { %1438 = shalt.err (!%p1435_p5)
}
  0x67   :  { %104 = dma.hbm_to_vmem [thread:$0]  %s1747_s8, 1024, %s1637_s21, [#allocation13], %s1473_s26, %s1473_s26, %s1474_s27  }
  0x68   :  { %1461 = dma.done.wait [#allocation4], 256  }
  0x69   :  { %1462 = vsyncadd [#allocation4], 4294967040 }
  0x6a   :  { %1463 = dma.done.wait [#allocation7], 512  }
  0x6b   :  { %1464 = vsyncadd [#allocation7], 4294966784 }
  0x6c   :  { %1465 = dma.done.wait [#allocation10], 2048  }
  0x6d   :  { %1466 = vsyncadd [#allocation10], 4294965248 }
  0x6e   :  { %1467 = dma.done.wait [#allocation13], 1024  }
  0x6f   :  { %1468 = vsyncadd [#allocation13], 4294966272  ;;  %vm144_vm0 = vcmask 1040384   ;;  %vm137_vm1 = vcmask 72704   ;;  %vm1479_vm2 = vmmov 1   ;;  %v135_v1 = vld [vmem:[#allocation8] sm:$0xff] }
  0x70   :  { %vm1203_vm3 = vmpackc.low %vm144_vm0, %vm1479_vm2  ;;  %v136_v2 = vld [vmem:[#allocation8 + $0x8] sm:$0x1]  ;;  %v133_v3 = vld [vmem:[#allocation6] sm:$0xff]  ;;  %vm230_vm4 = vcmask 130048   ;;  %vm322_vm5 = vcmask 523264   ;;  %vm835_vm6 = vcmask 123904  }
  0x71   :  { %v1202_v4 = vpack.c.bf16 %v136_v2, %v135_v1  ;;  %1107 = vmatprep.mubr.msk.f32.mxu1 %vm137_vm1, %v133_v3  ;;  %v134_v5 = vld [vmem:[#allocation6 + $0x8] sm:$0xff]  ;;  %v1674_v6 = vld [vmem:[#allocation3] sm:$0xff]  ;;  %v1678_v10 = vld [vmem:[#allocation3 + $0x8] sm:$0xff]  ;;  %vm1481_vm7 = vmmov 0   ;;  %vm973_vm12 = vcmask 1041409   ;;  %vm990_vm13 = vcmask 1041408  }
  0x72   :  { %v314_v11 = vld [vmem:[#allocation9] sm:$0xff]  ;;  %v315_v12 = vld [vmem:[#allocation9 + $0x8] sm:$0xff]  ;;  %v316_v14 = vld [vmem:[#allocation9 + $0x10] sm:$0xff]  ;;  %s1484_s16 = smov [#allocation14]  }
  0x73   :  { %1204 = vmatprep.subr.msk.bf16.mxu1 %vm1203_vm3, %v1202_v4  ;;  %v1212_v13 = vpack.c.bf16 %v315_v12, %v314_v11  ;;  %v317_v15 = vld [vmem:[#allocation9 + $0x18] sm:$0xff]  ;;  %v318_v17 = vld [vmem:[#allocation9 + $0x20] sm:$0xff]  ;;  %v319_v18 = vld [vmem:[#allocation9 + $0x28] sm:$0xff]  ;;  %v915_v12 = vlaneseq  ;;  %s1010_s12 = sshll.u32 %s1484_s16, 4  ;;  %s1011_s12 = int_to_ptr.vmem [resolvable:$true] %s1010_s12 }
  0x74   :  { %1207 = vmatpush3.bf16.msk.msra.mxu1 %vm1203_vm3, %v1202_v4  ;;  %v1216_v16 = vpack.c.bf16 %v317_v15, %v316_v14  ;;  %v320_v19 = vld [vmem:[#allocation9 + $0x30] sm:$0xff]  ;;  %v1220_v20 = vpack.c.bf16 %v319_v18, %v318_v17  ;;  %v321_v21 = vld [vmem:[#allocation9 + $0x38] sm:$0xff]  ;;  %v1029_v23 = vld [vmem:[%s1742_s3] ss:$0 sm:$0xff]  ;;  %s1439_s2 = scalar_lea.vmem %s1011_s12, 32  ;;  %p1444_p7 = scmp.lt.s32.totalorder %s1011_s12, %s1011_s12 }
  0x75   :  { %1213 = vmatprep.subr.bf16.mxu0 %v1212_v13  ;;  %v1224_v22 = vpack.c.bf16 %v321_v21, %v320_v19  ;;  %v488_v33 = vld [vmem:[#allocation11] sm:$0xff]  ;;  %v489_v34 = vld [vmem:[#allocation11 + $0x8] sm:$0xff]  ;;  %v490_v36 = vld [vmem:[#allocation11 + $0x10] sm:$0xff]  ;;  %v916_v14 = vshrl.u32 %v915_v12, 7  ;;  %p1440_p6 = scmp.ne.s32.totalorder %s1011_s12, %s1439_s2  ;;  %p1445_p8 = scmp.lt.s32.totalorder %s1439_s2, %s1439_s2 }
  0x76   :  { %1215 = vmatpush3.bf16.msra.mxu0 %v1212_v13  ;;  %v1232_v35 = vpack.c.bf16 %v489_v34, %v488_v33  ;;  %v491_v37 = vld [vmem:[#allocation11 + $0x18] sm:$0xff]  ;;  %v492_v39 = vld [vmem:[#allocation11 + $0x20] sm:$0xff]  ;;  %v493_v40 = vld [vmem:[#allocation11 + $0x28] sm:$0xff] }
  0x77   :  { %1108 = vmatmul.mubr.msk.f32.vlgmr.msra.gmra.mrb[0].mxu1 %vm137_vm1, %v134_v5  ;;  %1217 = vmatprep.subr.bf16.mxu0 %v1216_v16  ;;  %v1236_v38 = vpack.c.bf16 %v491_v37, %v490_v36  ;;  %v494_v41 = vld [vmem:[#allocation11 + $0x30] sm:$0xff]  ;;  %v1240_v42 = vpack.c.bf16 %v493_v40, %v492_v39  ;;  %v495_v43 = vld [vmem:[#allocation11 + $0x38] sm:$0xff]  ;;  %v1034_v45 = vld [vmem:[%s1744_s5] ss:$0 sm:$0xff]  ;;  %v917_v15 = vsub.s32 0, %v916_v14  ;;  %p1446_p9 = por %p1445_p8, %p1444_p7 }
  0x78   :  { %1114 = vmatprep.mubr.msk.f32.mxu1 %vm230_vm4, %v1674_v6  ;;  %v1244_v44 = vpack.c.bf16 %v495_v43, %v494_v41  ;;  %v661_v55 = vld [vmem:[#allocation12] sm:$0xff]  ;;  %v662_v56 = vld [vmem:[#allocation12 + $0x8] sm:$0xff]  ;;  %v663_v58 = vld [vmem:[#allocation12 + $0x10] sm:$0xff] }
  0x79   :  { %v1252_v57 = vpack.c.bf16 %v662_v56, %v661_v55  ;;  %v664_v59 = vld [vmem:[#allocation12 + $0x18] sm:$0xff]  ;;  %v665_v61 = vld [vmem:[#allocation12 + $0x20] sm:$0xff]  ;;  %v666_v62 = vld [vmem:[#allocation12 + $0x28] sm:$0xff]  ;;  %p1447_p10 = pnand %p1446_p9, %p1440_p6 }
  0x7a   :  { %1219 = vmatpush3.bf16.msra.mxu0 %v1216_v16  ;;  %v1256_v60 = vpack.c.bf16 %v664_v59, %v663_v58  ;;  %v667_v63 = vld [vmem:[#allocation12 + $0x30] sm:$0xff]  ;;  %v1260_v0 = vpack.c.bf16 %v666_v62, %v665_v61  ;;  %v668_v1 = vld [vmem:[#allocation12 + $0x38] sm:$0xff]  ;;  %v1039_v3 = vld [vmem:[%s1746_s7] ss:$0 sm:$0xff]  ;;  %v928_v16 = vsub.s32 1, %v916_v14 }
  0x7b   :  { %1221 = vmatprep.subr.bf16.mxu0 %v1220_v20  ;;  %v1264_v2 = vpack.c.bf16 %v668_v1, %v667_v63  ;;  %v834_v11 = vld [vmem:[%s1749_s10] sm:$0x3] }
  0x7c   :  { %v836_v13 = vsel %vm835_vm6, %v834_v11, 0.0  ;;  %v918_v17 = vrot.slane %v834_v11, %v917_v15  ;;  %v929_v18 = vrot.slane %v834_v11, %v928_v16 }
  0x7d   :  { %837 = vadd.xlane.f32.xlu0 %v836_v13 }
  0x7e   :  { %1223 = vmatpush3.bf16.msra.mxu0 %v1220_v20  ;;  %924 = vbcast.lane.b32.xlu1 %v918_v17, 264 }
  0x7f   :  { %1225 = vmatprep.subr.bf16.mxu0 %v1224_v22 }
  0x82   :  { %1227 = vmatpush3.bf16.msra.mxu0 %v1224_v22  ;;  %931 = vbcast.lane.b32.xlu1 %v929_v18, 256  ;;  %v1480_v22 = vmov 0.0|0.0  }
  0x86   :  { %935 = vbcast.lane.b32.xlu1 %v929_v18, 264 }
  0x93   :  { %920 = vbcast.lane.b32.xlu0 %v918_v17, 256 }
 0x14a   :  { %v1109_v7 = vpop.f32.mrb[0].mxu1 }
 0x14b   :  { %v214_v8 = vpop.f32.mrb[1].mxu1 }
 0x14c   :  { %v1208_v9 = vpack.c.bf16 %v1109_v7, %v214_v8 }
 0x14e   :  { %1209 = vmatprep.subr.bf16.mxu1 %v1208_v9 }
 0x14f   :  { %1211 = vmatpush3.bf16.msra.mxu1 %v1208_v9 }
 0x152   :  { %1115 = vmatmul.mubr.msk.f32.vlgmr.msra.gmra.mrb[2].mxu1 %vm230_vm4, %v1678_v10 }
 0x153   :  { %1140 = vmatprep.mubr.msk.f32.mxu1 %vm230_vm4, %v1674_v6 }
 0x225   :  { %v1116_v24 = vpop.f32.mrb[2].mxu1 }
 0x226   :  { %v309_v25 = vadd.f32 %v1116_v24, %v1029_v23  ;;  %v303_v26 = vpop.f32.mrb[3].mxu1  ;;  %v925_v24 = vpop.permute.xlu1 %924 }
 0x227   :  { %v304_v27 = vadd.f32 %v1029_v23, %v303_v26  ;;  %v1482_v23 = vmov 0.0   ;;  %vm938_vm8 = vcmp.gt.f32.partialorder %v925_v24, 0.0 }
 0x229   :  { %1289 = vtanh.f32 %v304_v27 }
 0x22a   :  { %1291 = vtanh.f32 %v309_v25  ;;  %v1044_v25 = vld [vmem:[%s1748_s9] ss:$0 sm:$0xff]  ;;  %s1483_s9 = smov 64  }
 0x233   :  { %v1290_v28 = vpop.eup %1289 }
 0x234   :  { %v1292_v29 = vpop.eup %1291  ;;  %1133 = vmatprep.mubr.msk.f32.mxu0 %vm322_vm5, %v1290_v28 }
 0x235   :  { %1134 = vmatmul.mubr.msk.f32.vlgmr.msra.gmra.mrb[0].mxu0 %vm322_vm5, %v1292_v29 }
 0x236   :  { %1166 = vmatprep.mubr.msk.f32.mxu0 %vm230_vm4, %v1674_v6 }
 0x308   :  { %v1135_v30 = vpop.f32.mrb[0].mxu0 }
 0x309   :  { %v395_v31 = vpop.f32.mrb[1].mxu0 }
 0x30a   :  { %v1228_v32 = vpack.c.bf16 %v1135_v30, %v395_v31  ;;  %v932_v30 = vpop.permute.xlu1 %931  ;;  %v838_v31 = vpop.xlane.xlu0 %837 }
 0x30b   :  { %vm939_vm10 = vcmp.gt.f32.partialorder %v932_v30, 0.0  ;;  %v839_v59 = vmax.f32 %v838_v31, 1.0 }
 0x30c   :  { %1229 = vmatprep.subr.bf16.mxu1 %v1228_v32 }
 0x30d   :  { %1231 = vmatpush3.bf16.msra.mxu1 %v1228_v32 }
 0x30e   :  { %1233 = vmatprep.subr.bf16.mxu1 %v1232_v35  ;;  %v936_v32 = vpop.permute.xlu1 %935 }
 0x30f   :  { %vm940_vm9 = vcmp.gt.f32.partialorder %v936_v32, 0.0 }
 0x310   :  { %1141 = vmatmul.mubr.msk.f32.vlgmr.msra.gmra.mrb[4].mxu1 %vm230_vm4, %v1678_v10 }
 0x311   :  { %1235 = vmatpush3.bf16.msra.mxu1 %v1232_v35 }
 0x312   :  { %1237 = vmatprep.subr.bf16.mxu1 %v1236_v38 }
 0x315   :  { %1239 = vmatpush3.bf16.msra.mxu1 %v1236_v38 }
 0x316   :  { %1241 = vmatprep.subr.bf16.mxu1 %v1240_v42 }
 0x319   :  { %1243 = vmatpush3.bf16.msra.mxu1 %v1240_v42 }
 0x31a   :  { %1245 = vmatprep.subr.bf16.mxu1 %v1244_v44 }
 0x31d   :  { %1247 = vmatpush3.bf16.msra.mxu1 %v1244_v44 }
 0x3e3   :  { %v1142_v46 = vpop.f32.mrb[4].mxu1 }
 0x3e4   :  { %v483_v47 = vadd.f32 %v1142_v46, %v1034_v45  ;;  %v477_v48 = vpop.f32.mrb[5].mxu1 }
 0x3e5   :  { %v478_v49 = vadd.f32 %v1034_v45, %v477_v48 }
 0x3e7   :  { %1293 = vtanh.f32 %v478_v49 }
 0x3e8   :  { %1295 = vtanh.f32 %v483_v47 }
 0x3f1   :  { %v1294_v50 = vpop.eup %1293 }
 0x3f2   :  { %v1296_v51 = vpop.eup %1295  ;;  %1159 = vmatprep.mubr.msk.f32.mxu1 %vm322_vm5, %v1294_v50 }
 0x3f3   :  { %1160 = vmatmul.mubr.msk.f32.vlgmr.msra.gmra.mrb[6].mxu1 %vm322_vm5, %v1296_v51 }
 0x3f4   :  { %1192 = vmatprep.mubr.msk.f32.mxu1 %vm230_vm4, %v1674_v6 }
 0x4c6   :  { %v1161_v52 = vpop.f32.mrb[6].mxu1 }
 0x4c7   :  { %v568_v53 = vpop.f32.mrb[7].mxu1 }
 0x4c8   :  { %v1248_v54 = vpack.c.bf16 %v1161_v52, %v568_v53 }
 0x4ca   :  { %1249 = vmatprep.subr.bf16.mxu0 %v1248_v54 }
 0x4cb   :  { %1251 = vmatpush3.bf16.msra.mxu0 %v1248_v54 }
 0x4cc   :  { %1253 = vmatprep.subr.bf16.mxu0 %v1252_v57 }
 0x4ce   :  { %1167 = vmatmul.mubr.msk.f32.vlgmr.msra.gmra.mrb[2].mxu0 %vm230_vm4, %v1678_v10 }
 0x4cf   :  { %1255 = vmatpush3.bf16.msra.mxu0 %v1252_v57 }
 0x4d0   :  { %1257 = vmatprep.subr.bf16.mxu0 %v1256_v60 }
 0x4d3   :  { %1259 = vmatpush3.bf16.msra.mxu0 %v1256_v60 }
 0x4d4   :  { %1261 = vmatprep.subr.bf16.mxu0 %v1260_v0 }
 0x4d7   :  { %1263 = vmatpush3.bf16.msra.mxu0 %v1260_v0  ;;  %v1048_v0 = vld [vmem:[%s1750_s11] ss:$0 sm:$0xff] }
 0x4d8   :  { %1265 = vmatprep.subr.bf16.mxu0 %v1264_v2 }
 0x4db   :  { %1267 = vmatpush3.bf16.msra.mxu0 %v1264_v2 }
 0x5a1   :  { %v1168_v4 = vpop.f32.mrb[2].mxu0 }
 0x5a2   :  { %v656_v5 = vadd.f32 %v1168_v4, %v1039_v3  ;;  %v650_v6 = vpop.f32.mrb[3].mxu0 }
 0x5a3   :  { %v651_v7 = vadd.f32 %v1039_v3, %v650_v6 }
 0x5a5   :  { %1297 = vtanh.f32 %v651_v7 }
 0x5a6   :  { %1299 = vtanh.f32 %v656_v5 }
 0x5af   :  { %v1298_v8 = vpop.eup %1297 }
 0x5b0   :  { %v1300_v9 = vpop.eup %1299  ;;  %1185 = vmatprep.mubr.msk.f32.mxu0 %vm322_vm5, %v1298_v8 }
 0x5b1   :  { %1186 = vmatmul.mubr.msk.f32.vlgmr.msra.gmra.mrb[4].mxu0 %vm322_vm5, %v1300_v9 }
 0x684   :  { %v1187_v19 = vpop.f32.mrb[4].mxu0 }
 0x685   :  { %v741_v20 = vpop.f32.mrb[5].mxu0 }
 0x686   :  { %v1268_v21 = vpack.c.bf16 %v1187_v19, %v741_v20 }
 0x688   :  { %1269 = vmatprep.subr.bf16.mxu1 %v1268_v21 }
 0x689   :  { %1271 = vmatpush3.bf16.msra.mxu1 %v1268_v21 }
 0x68a   :  { %1272 = vmatprep.subr.bf16.mxu1 %v1480_v22 }
 0x68c   :  { %1193 = vmatmul.mubr.msk.f32.vlgmr.msra.gmra.mrb[8].mxu1 %vm230_vm4, %v1678_v10  ;;  %v921_v10 = vpop.permute.xlu0 %920 }
 0x68d   :  { %1199 = vmatprep.mubr.msk.f32.mxu1 %vm1481_vm7, %v1482_v23  ;;  %vm937_vm11 = vcmp.gt.f32.partialorder %v921_v10, 0.0 }
 0x75f   :  { %v1194_v26 = vpop.f32.mrb[8].mxu1 }
 0x760   :  { %v829_v27 = vadd.f32 %v1194_v26, %v1044_v25  ;;  %v823_v28 = vpop.f32.mrb[9].mxu1 }
 0x761   :  { %v824_v29 = vadd.f32 %v1044_v25, %v823_v28 }
 0x762   :  { %1301 = vtanh.f32 %v829_v27 }
 0x763   :  { %1303 = vtanh.f32 %v824_v29 }
 0x764   :  { %1305 = vrcp.f32 %v839_v59 }
 0x76c   :  { %v1302_v33 = vpop.eup %1301 }
 0x76d   :  { %v1304_v34 = vpop.eup %1303  ;;  %v950_v35 = vsel %vm938_vm8, %v1302_v33, -1e+30  ;;  %v952_v36 = vsel %vm940_vm9, %v1302_v33, -1e+30 }
 0x76e   :  { %v954_v37 = vsel %vm322_vm5, %v950_v35, -inf  ;;  %v951_v38 = vsel %vm939_vm10, %v1304_v34, -1e+30  ;;  %v963_v39 = vsel %vm322_vm5, %v952_v36, -inf  ;;  %v949_v40 = vsel %vm937_vm11, %v1304_v34, -1e+30  ;;  %v1306_v60 = vpop.eup %1305 }
 0x76f   :  { %v962_v41 = vsel %vm322_vm5, %v951_v38, -inf  ;;  %v953_v42 = vsel %vm322_vm5, %v949_v40, -inf  ;;  %v1273_v43 = vpack.c.bf16 %v1302_v33, %v1304_v34 }
 0x770   :  { %v964_v44 = vmax.f32 %v962_v41, %v963_v39  ;;  %v955_v45 = vmax.f32 %v953_v42, %v954_v37 }
 0x771   :  { %1274 = vmatpush3.bf16.msra.mxu1 %v1273_v43 }
 0x772   :  { %v965_v46 = vrot.slane %v964_v44, 4  ;;  %v956_v47 = vrot.slane %v955_v45, 4 }
 0x774   :  { %v966_v48 = vmax.f32 %v964_v44, %v965_v46  ;;  %v957_v49 = vmax.f32 %v955_v45, %v956_v47  ;;  %1200 = vmatmul.mubr.msk.f32.vlgmr.msra.gmra.mrb[10].mxu1 %vm230_vm4, %v834_v11 }
 0x776   :  { %v967_v50 = vrot.slane %v966_v48, 2  ;;  %v958_v51 = vrot.slane %v957_v49, 2 }
 0x778   :  { %v968_v52 = vmax.f32 %v966_v48, %v967_v50  ;;  %v959_v53 = vmax.f32 %v957_v49, %v958_v51 }
 0x77a   :  { %v969_v54 = vrot.slane %v968_v52, 1  ;;  %v960_v55 = vrot.slane %v959_v53, 1 }
 0x77c   :  { %v961_v56 = vmax.f32 %v959_v53, %v960_v55  ;;  %v970_v57 = vmax.f32 %v968_v52, %v969_v54 }
 0x77e   :  { %v974_v58 = vsel %vm973_vm12, %v970_v57, %v961_v56 }
 0x847   :  { %v910_v61 = vpop.f32.mrb[10].mxu1 }
 0x848   :  { %v914_v62 = vmul.f32 %v1306_v60, %v910_v61  ;;  %v1201_v63 = vpop.f32.mrb[11].mxu1 }
 0x84a   :  { %977 = vrot.lane.b32.xlu1 %v914_v62, %s1483_s9 }
 0x8bc   :  { %v978_v1 = vpop.permute.xlu1 %977 }
 0x8bd   :  { %v980_v2 = vsel %vm322_vm5, %v974_v58, %v978_v1 }
 0x8be   :  { %981 = vst [vmem:[#allocation14] sm:$0x3] %v980_v2  ;;  %v989_v3 = vmul.f32 %v1048_v0, %v980_v2 }
 0x8c0   :  { %v991_v4 = vsel %vm990_vm13, %v989_v3, 0.0 }
 0x8c1   :  { %992 = vadd.xlane.f32.xlu1 %v991_v4 }
 0x8c2   :  { %1450 = shalt.err (!%p1447_p10)
}
 0x8c3   :  { %s1451_s25 = scalar_lea.hbm %s1752_s13, 32 }
 0x8c4   :  { %p1452_p11 = scmp.ne.s32.totalorder %s1752_s13, %s1451_s25  ;;  %p1455_p12 = scmp.lt.u32.totalorder %s1451_s25, %s1752_s13 }
 0x8c6   :  { %p1457_p13 = pnand %p1455_p12, %p1452_p11 }
 0x8c8   :  { %1460 = shalt.err (!%p1457_p13)
}
 0x8c9   :  { %1013 = dma.vmem_to_hbm [thread:$0]  %s1011_s12, 32, %s1752_s13, [#allocation5]   ;;  %v1049_v5 = vld [vmem:[#allocation2] ss:$0 sm:$0xff]  ;;  %vm1002_vm14 = vcmask 1024  }
 0x94e   :  { %v993_v6 = vpop.xlane.xlu1 %992 }
 0x94f   :  { %v1001_v7 = vadd.f32 %v1049_v5, %v993_v6 }
 0x951   :  { %1003 = vst.msk [vmem:[%s1753_s14] sm:$0x3] %vm1002_vm14, %v1001_v7 }
 0x952   :  { %1469 = dma.done.wait [#allocation5], 32  }
 0x953   :  { %1470 = vsyncadd [#allocation5], 4294967264 }
 0x954   :  { %1021 = vsyncpa [#allocation4], 1 }
 0x955   :  { %1022 = vsyncpa [#allocation7], 1 }
 0x956   :  { %1023 = vsyncpa [#allocation10], 1 }
 0x957   :  { %1024 = vsyncpa [#allocation13], 1 }
 0x958   :  { %1025 = vsyncpa [#allocation5], 1 }

</bundles_post_ra>
